<compile_context>
chip_gen: v7x
topology: tpu7x:2x2x1
jax: 0.10.0
libtpu: 0.0.40
codegen_flags: <defaults>
</compile_context>

<pallas_src>
import jax
import jax.numpy as jnp
import numpy as np
from jax.experimental import pallas as pl
from jax.experimental.pallas import tpu as pltpu


def _make_sdpa_kernel(inv_scale, has_mask, g_sub, n_rep):
    def kernel(*refs):
        if has_mask:
            q_ref, k_ref, v_ref, mask_ref, o_ref, w_ref = refs
        else:
            q_ref, k_ref, v_ref, o_ref, w_ref = refs
            mask_ref = None

        gh, tq, d = q_ref.shape            # gh = g_sub * n_rep
        s_len = k_ref.shape[-2]
        m_rows = n_rep * tq                # MXU M rows per KV group

        # Fold 1/scale into Q (Q*D multiplies, native dtype) instead of scaling the
        # (M, S) f32 score tile.
        # TODO(synk): for bit-level parity with torch on bf16 inputs, scale the f32
        # scores instead (one extra VPU pass over (M, S)).
        q = q_ref[...] * inv_scale

        if g_sub == 1:
            # 2-D MXU path: contract on head_dim of both operands (no K transpose).
            s = jax.lax.dot_general(
                q.reshape(m_rows, d), k_ref[...].reshape(s_len, d),
                dimension_numbers=(((1,), (1,)), ((), ())),
                preferred_element_type=jnp.float32)              # (M, S) f32
            s = s.reshape(gh, tq, s_len)
        else:
            # Batched over the G_sub KV groups handled in this step.
            s = jnp.einsum(
                "gmd,gsd->gms", q.reshape(g_sub, m_rows, d), k_ref[...],
                preferred_element_type=jnp.float32)              # (G, M, S) f32
            s = s.reshape(gh, tq, s_len)

        if has_mask:
            # Native-dtype mask DMA; one small (TQ, S) cast here, broadcast over heads
            # (no jnp.tile, no materialized (M, S) mask copy).
            s = s + mask_ref[...].astype(jnp.float32)[None, :, :]

        # softmax in f32 (torch: softmax(..., dtype=float32).to(query.dtype))
        mx = jnp.max(s, axis=-1, keepdims=True)
        e = jnp.exp(s - mx)
        p = e * pl.reciprocal(jnp.sum(e, axis=-1, keepdims=True), approx=False)

        # Single downcast serves both the attn_weights write and the PV matmul feed.
        p_lo = p.astype(w_ref.dtype)
        w_ref[...] = p_lo

        if g_sub == 1:
            pv = jax.lax.dot_general(
                p_lo.reshape(m_rows, s_len).astype(v_ref.dtype),
                v_ref[...].reshape(s_len, d),
                dimension_numbers=(((1,), (0,)), ((), ())),
                preferred_element_type=jnp.float32)              # (M, D)
        else:
            pv = jnp.einsum(
                "gms,gsd->gmd",
                p_lo.reshape(g_sub, m_rows, s_len).astype(v_ref.dtype), v_ref[...],
                preferred_element_type=jnp.float32)              # (G, M, D)
        o_ref[...] = pv.reshape(gh, tq, d).astype(o_ref.dtype)

    return kernel


def _select_tiling(*, Q, S, D, n_rep, KVH, q_bytes, kv_bytes, mask_bytes,
                   out_bytes, has_mask, budget):
    """VMEM-aware choice of (TQ, G_sub) and the per-step footprint estimate."""
    pack = max(8, 32 // q_bytes)           # sublane pack: f32->8, bf16->16, int8->32
    m_cap = 256                            # MXU M tile (256 on v6e/v7x, 128 on v5e):
                                           # no MXU-efficiency gain above this.

    cands = sorted({c for c in (512, 256, 128, 64, 32, 16, 8)
                    if Q % c == 0 and c % pack == 0} | {Q}, reverse=True)

    def footprint(tq, g):
        m = g * n_rep * tq
        dma = 2 * (g * n_rep * tq * D * q_bytes           # q block (double-buffered)
                   + 2 * g * S * D * kv_bytes             # K + V blocks
                   + (tq * S * mask_bytes if has_mask else 0)
                   + g * n_rep * tq * D * out_bytes       # o block
                   + m * S * out_bytes)                   # w block (largest writeback)
        live = 3 * m * S * 4                              # f32 s / e / p intermediates
        return dma + live

    tq = None
    for c in cands:
        if n_rep * c <= m_cap and footprint(c, 1) <= budget:
            tq = c
            break
    if tq is None:
        tq = cands[-1]                     # smallest legal tile; vmem_limit guards rest

    g_sub = 1
    if n_rep * tq < 128:                   # decode-ish shapes: amortize per-step overhead
        for g in range(min(KVH, 8), 1, -1):
            if KVH % g == 0 and footprint(tq, g) <= budget:
                g_sub = g
                break
    return tq, g_sub, footprint(tq, g_sub)


def ipex_sdp_llama(query, key, value, scale_attn, num_key_value_groups,
                   layer_past=None, attention_mask=None):
    """Reproduces _IPEXScaleDotProductRef.forward for the llama backbone.

    query : (B, H, Q, D), key : (B, KVH, S_new, D), value : (B, S_new, KVH, D).
    Returns (attn_output (B,H,Q,D), attn_weights (B,H,Q,S), present=(key, value)).
    """
    # --- glue outside the hot path (matches the torch forward) ---
    value = jnp.transpose(value, (0, 2, 1, 3))            # (B, KVH, S_new, D)
    if layer_past is not None:
        key = jnp.concatenate((layer_past[0], key), axis=-2)
        value = jnp.concatenate((layer_past[1], value), axis=-2)
    present = (key, value)

    B, H, Q, D = query.shape
    _, KVH, S, _ = key.shape
    n_rep = int(num_key_value_groups) if num_key_value_groups else 1
    assert H == KVH * n_rep, "num_heads must equal num_kv_heads * num_key_value_groups"

    has_mask = attention_mask is not None
    if has_mask:
        assert attention_mask.shape == (B, 1, Q, S), (
            f"attention_mask must be (B, 1, Q, S), got {attention_mask.shape}")

    q_bytes = query.dtype.itemsize
    kv_bytes = key.dtype.itemsize
    out_bytes = query.dtype.itemsize
    mask_bytes = attention_mask.dtype.itemsize if has_mask else 0

    # --- VMEM budget (per-TensorCore capacity differs per generation) ---
    try:
        vmem_cap = int(pltpu.get_tpu_info().vmem_capacity_bytes)
    except Exception:
        vmem_cap = 64 * 1024 * 1024                       # conservative (v7x per-TC)
    budget = min(vmem_cap // 2, 64 * 1024 * 1024)          # v7x ~32 MiB, v5e/v6e 64 MiB

    TQ, G_sub, est = _select_tiling(
        Q=Q, S=S, D=D, n_rep=n_rep, KVH=KVH, q_bytes=q_bytes, kv_bytes=kv_bytes,
        mask_bytes=mask_bytes, out_bytes=out_bytes, has_mask=has_mask, budget=budget)
    num_q = Q // TQ
    num_gb = KVH // G_sub
    GH = G_sub * n_rep
    vmem_limit = int(min(0.9 * vmem_cap, max(2 * est, 32 * 1024 * 1024)))

    inv_scale = 1.0 / float(scale_attn)

    # --- grid ordering: revisit the cheaper operand along the innermost axis ---
    # qi innermost keeps K/V resident (no re-DMA).  Swap when mask re-reads across
    # group blocks would exceed K/V re-reads across Q tiles.
    swap = (has_mask and num_q > 1 and num_gb > 1 and
            Q * S * mask_bytes * (num_gb - 1) > 2 * KVH * S * D * kv_bytes * (num_q - 1))
    if swap:
        grid = (B, num_q, num_gb)
        q_map = lambda b, qi, g: (b, g, qi, 0)
        kv_map = lambda b, qi, g: (b, g, 0, 0)
        mk_map = lambda b, qi, g: (b, 0, qi, 0)
    else:
        grid = (B, num_gb, num_q)
        q_map = lambda b, g, qi: (b, g, qi, 0)
        kv_map = lambda b, g, qi: (b, g, 0, 0)
        mk_map = lambda b, g, qi: (b, 0, qi, 0)

    in_specs = [
        pl.BlockSpec((None, GH, TQ, D), q_map),            # all heads of G_sub KV groups
        pl.BlockSpec((None, G_sub, S, D), kv_map),         # K (repeat_kv folded in map)
        pl.BlockSpec((None, G_sub, S, D), kv_map),         # V
    ]
    inputs = [query, key, value]
    if has_mask:
        in_specs.append(pl.BlockSpec((None, None, TQ, S), mk_map))   # native-dtype mask
        inputs.append(attention_mask)

    out_specs = [
        pl.BlockSpec((None, GH, TQ, D), q_map),
        pl.BlockSpec((None, GH, TQ, S), q_map),
    ]
    out_shapes = (
        jax.ShapeDtypeStruct((B, H, Q, D), query.dtype),
        jax.ShapeDtypeStruct((B, H, Q, S), query.dtype),
    )

    cost = pl.CostEstimate(
        flops=4 * B * H * Q * S * D,
        transcendentals=B * H * Q * S,
        bytes_accessed=(query.size * q_bytes + key.size * kv_bytes
                        + value.size * kv_bytes
                        + (B * Q * S * mask_bytes if has_mask else 0)
                        + B * H * Q * D * out_bytes + B * H * Q * S * out_bytes))

    attn_output, attn_weights = pl.pallas_call(
        _make_sdpa_kernel(inv_scale, has_mask, G_sub, n_rep),
        out_shape=out_shapes,
        grid_spec=pltpu.PrefetchScalarGridSpec(
            num_scalar_prefetch=0,
            grid=grid,
            in_specs=in_specs,
            out_specs=out_specs,
        ),
        compiler_params=pltpu.CompilerParams(
            dimension_semantics=("parallel", "parallel", "parallel"),
            vmem_limit_bytes=vmem_limit),
        cost_estimate=cost,
    )(*inputs)

    return attn_output, attn_weights, present


def _reference(query, key, value, scale_attn, n_rep, attention_mask=None):
    # pure-JAX reference mirroring the torch llama branch
    value = jnp.transpose(value, (0, 2, 1, 3))
    key_r = jnp.repeat(key, n_rep, axis=1)
    value_r = jnp.repeat(value, n_rep, axis=1)
    w = jnp.einsum("bhqd,bhkd->bhqk", query, key_r) / scale_attn
    if attention_mask is not None:
        w = w + attention_mask
    w = jax.nn.softmax(w.astype(jnp.float32), axis=-1).astype(query.dtype)
    o = jnp.einsum("bhqk,bhkd->bhqd", w, value_r)
    return o, w


if __name__ == "__main__":
    rng = jax.random.PRNGKey(0)

    # Config 1: small GQA shape with causal additive mask (exercises the group-batched
    # MXU path, G_sub > 1).
    B, H, KVH, Q, S, D = 2, 4, 2, 8, 8, 32
    n_rep = H // KVH
    scale_attn = float(np.sqrt(D))
    kq, kk, kv, rng = jax.random.split(rng, 4)
    query = jax.random.normal(kq, (B, H, Q, D), dtype=jnp.float32)
    key = jax.random.normal(kk, (B, KVH, S, D), dtype=jnp.float32)
    value = jax.random.normal(kv, (B, S, KVH, D), dtype=jnp.float32)
    mask_bool = jnp.tril(jnp.ones((Q, S), dtype=bool))
    attention_mask = jnp.where(mask_bool, 0.0, -1e9).astype(jnp.float32)
    attention_mask = jnp.broadcast_to(attention_mask[None, None], (B, 1, Q, S))

    out, w, present = ipex_sdp_llama(query, key, value, scale_attn, n_rep,
                                     layer_past=None, attention_mask=attention_mask)
    jax.block_until_ready((out, w, present))
    ref_o, ref_w = _reference(query, key, value, scale_attn, n_rep, attention_mask)
    # Tolerance accounts for possible MXU-vs-XLA default f32 matmul precision
    # differences; structural bugs would produce O(0.1-1) errors.
    np.testing.assert_allclose(np.asarray(out), np.asarray(ref_o), rtol=1e-2, atol=1e-2)
    np.testing.assert_allclose(np.asarray(w), np.asarray(ref_w), rtol=1e-2, atol=1e-2)

    # Config 2: larger Q, no mask, n_rep*TQ >= 128 (exercises the 2-D MXU path and the
    # mask-free input list).
    B2, H2, KVH2, Q2, S2, D2 = 1, 2, 1, 128, 64, 32
    n_rep2 = H2 // KVH2
    scale2 = float(np.sqrt(D2))
    kq2, kk2, kv2, rng = jax.random.split(rng, 4)
    q2 = jax.random.normal(kq2, (B2, H2, Q2, D2), dtype=jnp.float32)
    k2 = jax.random.normal(kk2, (B2, KVH2, S2, D2), dtype=jnp.float32)
    v2 = jax.random.normal(kv2, (B2, S2, KVH2, D2), dtype=jnp.float32)
    out2, w2, _ = ipex_sdp_llama(q2, k2, v2, scale2, n_rep2,
                                 layer_past=None, attention_mask=None)
    jax.block_until_ready((out2, w2))
    ref_o2, ref_w2 = _reference(q2, k2, v2, scale2, n_rep2, None)
    np.testing.assert_allclose(np.asarray(out2), np.asarray(ref_o2), rtol=1e-2, atol=1e-2)
    np.testing.assert_allclose(np.asarray(w2), np.asarray(ref_w2), rtol=1e-2, atol=1e-2)

    print("KERNEL_OK")
</pallas_src>

<mosaic_0001>
module attributes {stable_mosaic.version = 11 : i64} {
  func.func @kernel(%arg0: i32, %arg1: i32, %arg2: i32, %arg3: memref<1x4x8x32xf32, #tpu.memory_space<vmem>>, %arg4: memref<1x2x8x32xf32, #tpu.memory_space<vmem>>, %arg5: memref<1x2x8x32xf32, #tpu.memory_space<vmem>>, %arg6: memref<1x1x8x8xf32, #tpu.memory_space<vmem>>, %arg7: memref<1x4x8x32xf32, #tpu.memory_space<vmem>>, %arg8: memref<1x4x8x8xf32, #tpu.memory_space<vmem>>) attributes {dimension_semantics = [#tpu.dimension_semantics<parallel>, #tpu.dimension_semantics<parallel>, #tpu.dimension_semantics<parallel>], iteration_bounds = array<i64: 2, 1, 1>, scalar_prefetch = 0 : i64, scratch_operands = 0 : i64, tpu.core_type = #tpu.core_type<tc>, window_params = [{transform_indices = @transform_0, window_bounds = array<i64: 1, 4, 8, 32>}, {transform_indices = @transform_1, window_bounds = array<i64: 1, 2, 8, 32>}, {transform_indices = @transform_2, window_bounds = array<i64: 1, 2, 8, 32>}, {transform_indices = @transform_3, window_bounds = array<i64: 1, 1, 8, 8>}, {transform_indices = @transform_4, window_bounds = array<i64: 1, 4, 8, 32>}, {transform_indices = @transform_5, window_bounds = array<i64: 1, 4, 8, 8>}]} {
    %c0 = arith.constant 0 : index
    %c0_0 = arith.constant 0 : index
    %c0_1 = arith.constant 0 : index
    %c0_2 = arith.constant 0 : index
    %0 = vector.load %arg3[%c0, %c0_0, %c0_1, %c0_2] : memref<1x4x8x32xf32, #tpu.memory_space<vmem>>, vector<1x4x8x32xf32>
    %1 = vector.shape_cast %0 : vector<1x4x8x32xf32> to vector<4x8x32xf32>
    %cst = arith.constant 0.176776692 : f32
    %2 = vector.broadcast %cst : f32 to vector<4x8x32xf32>
    %3 = arith.mulf %1, %2 : vector<4x8x32xf32>
    %4 = vector.shape_cast %3 : vector<4x8x32xf32> to vector<2x16x32xf32>
    %c0_3 = arith.constant 0 : index
    %c0_4 = arith.constant 0 : index
    %c0_5 = arith.constant 0 : index
    %c0_6 = arith.constant 0 : index
    %5 = vector.load %arg4[%c0_3, %c0_4, %c0_5, %c0_6] : memref<1x2x8x32xf32, #tpu.memory_space<vmem>>, vector<1x2x8x32xf32>
    %6 = vector.shape_cast %5 : vector<1x2x8x32xf32> to vector<2x8x32xf32>
    "tpu.trace_start"() <{level = 10 : i32, message = "gmd,gsd->gms"}> : () -> ()
    %cst_7 = arith.constant dense<0.000000e+00> : vector<2x16x8xf32>
    %7 = tpu.matmul %4, %6, %cst_7 {dimension_numbers = #tpu.dot_dimension_numbers<[2], [2], [1], [1], [0, 0, 0, 1, 1, 1], [0], [0]>} : vector<2x16x32xf32>, vector<2x8x32xf32>, vector<2x16x8xf32> -> vector<2x16x8xf32>
    "tpu.trace_stop"() : () -> ()
    %8 = vector.shape_cast %7 : vector<2x16x8xf32> to vector<4x8x8xf32>
    %c0_8 = arith.constant 0 : index
    %c0_9 = arith.constant 0 : index
    %c0_10 = arith.constant 0 : index
    %c0_11 = arith.constant 0 : index
    %9 = vector.load %arg6[%c0_8, %c0_9, %c0_10, %c0_11] : memref<1x1x8x8xf32, #tpu.memory_space<vmem>>, vector<1x1x8x8xf32>
    %10 = vector.shape_cast %9 : vector<1x1x8x8xf32> to vector<8x8xf32>
    %11 = vector.shape_cast %10 : vector<8x8xf32> to vector<1x8x8xf32>
    %12 = vector.broadcast %11 : vector<1x8x8xf32> to vector<4x8x8xf32>
    %13 = arith.addf %8, %12 : vector<4x8x8xf32>
    %cst_12 = arith.constant dense<0xFF800000> : vector<4x8xf32>
    %14 = vector.multi_reduction <maximumf>, %13, %cst_12 [2] : vector<4x8x8xf32> to vector<4x8xf32>
    %15 = vector.shape_cast %14 : vector<4x8xf32> to vector<4x8x1xf32>
    %16 = vector.broadcast %15 : vector<4x8x1xf32> to vector<4x8x8xf32>
    %17 = arith.subf %13, %16 : vector<4x8x8xf32>
    %18 = math.exp %17 : vector<4x8x8xf32>
    %cst_13 = arith.constant dense<0.000000e+00> : vector<4x8xf32>
    %19 = vector.multi_reduction <add>, %18, %cst_13 [2] : vector<4x8x8xf32> to vector<4x8xf32>
    %20 = vector.shape_cast %19 : vector<4x8xf32> to vector<4x8x1xf32>
    %21 = tpu.reciprocal %20 : vector<4x8x1xf32> -> vector<4x8x1xf32>
    %22 = vector.broadcast %21 : vector<4x8x1xf32> to vector<4x8x8xf32>
    %23 = arith.mulf %18, %22 : vector<4x8x8xf32>
    %c0_14 = arith.constant 0 : index
    %c0_15 = arith.constant 0 : index
    %c0_16 = arith.constant 0 : index
    %c0_17 = arith.constant 0 : index
    %24 = vector.load %arg8[%c0_14, %c0_15, %c0_16, %c0_17] : memref<1x4x8x8xf32, #tpu.memory_space<vmem>>, vector<1x4x8x8xf32>
    %25 = vector.shape_cast %24 : vector<1x4x8x8xf32> to vector<4x8x8xf32>
    %26 = vector.shape_cast %23 : vector<4x8x8xf32> to vector<1x4x8x8xf32>
    tpu.vector_store %arg8[%c0_14, %c0_15, %c0_16, %c0_17], %26 {strides = array<i32>} : memref<1x4x8x8xf32, #tpu.memory_space<vmem>>, vector<1x4x8x8xf32>,
    %27 = vector.shape_cast %23 : vector<4x8x8xf32> to vector<2x16x8xf32>
    %c0_18 = arith.constant 0 : index
    %c0_19 = arith.constant 0 : index
    %c0_20 = arith.constant 0 : index
    %c0_21 = arith.constant 0 : index
    %28 = vector.load %arg5[%c0_18, %c0_19, %c0_20, %c0_21] : memref<1x2x8x32xf32, #tpu.memory_space<vmem>>, vector<1x2x8x32xf32>
    %29 = vector.shape_cast %28 : vector<1x2x8x32xf32> to vector<2x8x32xf32>
    "tpu.trace_start"() <{level = 10 : i32, message = "gms,gsd->gmd"}> : () -> ()
    %cst_22 = arith.constant dense<0.000000e+00> : vector<2x16x32xf32>
    %30 = tpu.matmul %27, %29, %cst_22 {dimension_numbers = #tpu.dot_dimension_numbers<[2], [1], [1], [2], [0, 0, 0, 1, 1, 2], [0], [0]>} : vector<2x16x8xf32>, vector<2x8x32xf32>, vector<2x16x32xf32> -> vector<2x16x32xf32>
    "tpu.trace_stop"() : () -> ()
    %31 = vector.shape_cast %30 : vector<2x16x32xf32> to vector<4x8x32xf32>
    %c0_23 = arith.constant 0 : index
    %c0_24 = arith.constant 0 : index
    %c0_25 = arith.constant 0 : index
    %c0_26 = arith.constant 0 : index
    %32 = vector.load %arg7[%c0_23, %c0_24, %c0_25, %c0_26] : memref<1x4x8x32xf32, #tpu.memory_space<vmem>>, vector<1x4x8x32xf32>
    %33 = vector.shape_cast %32 : vector<1x4x8x32xf32> to vector<4x8x32xf32>
    %34 = vector.shape_cast %31 : vector<4x8x32xf32> to vector<1x4x8x32xf32>
    tpu.vector_store %arg7[%c0_23, %c0_24, %c0_25, %c0_26], %34 {strides = array<i32>} : memref<1x4x8x32xf32, #tpu.memory_space<vmem>>, vector<1x4x8x32xf32>,
    return
  }
  func.func @transform_0(%arg0: i32, %arg1: i32, %arg2: i32) -> (i32, i32, i32, i32) {
    %c0_i32 = arith.constant 0 : i32
    %c0_i32_0 = arith.constant 0 : i32
    return %arg0, %arg1, %arg2, %c0_i32 : i32, i32, i32, i32
  }
  func.func @transform_1(%arg0: i32, %arg1: i32, %arg2: i32) -> (i32, i32, i32, i32) {
    %c0_i32 = arith.constant 0 : i32
    %c0_i32_0 = arith.constant 0 : i32
    %c0_i32_1 = arith.constant 0 : i32
    return %arg0, %arg1, %c0_i32, %c0_i32_0 : i32, i32, i32, i32
  }
  func.func @transform_2(%arg0: i32, %arg1: i32, %arg2: i32) -> (i32, i32, i32, i32) {
    %c0_i32 = arith.constant 0 : i32
    %c0_i32_0 = arith.constant 0 : i32
    %c0_i32_1 = arith.constant 0 : i32
    return %arg0, %arg1, %c0_i32, %c0_i32_0 : i32, i32, i32, i32
  }
  func.func @transform_3(%arg0: i32, %arg1: i32, %arg2: i32) -> (i32, i32, i32, i32) {
    %c0_i32 = arith.constant 0 : i32
    %c0_i32_0 = arith.constant 0 : i32
    %c0_i32_1 = arith.constant 0 : i32
    return %arg0, %c0_i32, %arg2, %c0_i32_0 : i32, i32, i32, i32
  }
  func.func @transform_4(%arg0: i32, %arg1: i32, %arg2: i32) -> (i32, i32, i32, i32) {
    %c0_i32 = arith.constant 0 : i32
    %c0_i32_0 = arith.constant 0 : i32
    return %arg0, %arg1, %arg2, %c0_i32 : i32, i32, i32, i32
  }
  func.func @transform_5(%arg0: i32, %arg1: i32, %arg2: i32) -> (i32, i32, i32, i32) {
    %c0_i32 = arith.constant 0 : i32
    %c0_i32_0 = arith.constant 0 : i32
    return %arg0, %arg1, %arg2, %c0_i32 : i32, i32, i32, i32
  }
}

</mosaic_0001>

<bundles_post_ra>
// kernel: tpu_custom_call.1
= control target key start
LH: loop header
LB: loop body
LE: loop exit
PB: predicated region body
PF: predicated region fallthrough
CT: control target
= control target key end

     0   :  { %s1909_s0 = inlined_call_operand.hbm [shape: f32[2,4,8,32], index: 0, kind: input, shape index: {}]   ;;  %s1910_s1 = inlined_call_operand.hbm [shape: f32[2,2,8,32], index: 1, kind: input, shape index: {}]   ;;  %s1911_s2 = inlined_call_operand.hbm [shape: f32[2,2,8,32], index: 2, kind: input, shape index: {}]   ;;  %s1912_s3 = inlined_call_operand.hbm [shape: f32[2,1,8,8], index: 3, kind: input, shape index: {}]   ;;  %s1913_s4 = inlined_call_operand.hbm [shape: f32[2,4,8,32], index: 4, kind: output, shape index: {0}]   ;;  %s1914_s5 = inlined_call_operand.hbm [shape: f32[2,4,8,8], index: 5, kind: output, shape index: {1}]  }
   0x1   :  { %1929 = sst [smem:[#allocation23_spill]] %s1910_s1 }
   0x2   :  { %11 = vsyncpa [#allocation3], 0 }
   0x3   :  { %13 = vsyncpa [#allocation3 + $0x1], 0 }
   0x4   :  { %14 = vsyncpa [#allocation6], 0 }
   0x5   :  { %16 = vsyncpa [#allocation6 + $0x1], 0 }
   0x6   :  { %17 = vsyncpa [#allocation9], 0 }
   0x7   :  { %19 = vsyncpa [#allocation9 + $0x1], 0 }
   0x8   :  { %20 = vsyncpa [#allocation4], 0 }
   0x9   :  { %22 = vsyncpa [#allocation4 + $0x1], 0 }
   0xa   :  { %23 = vsyncpa [#allocation12], 0 }
   0xb   :  { %25 = vsyncpa [#allocation12 + $0x1], 0  ;;  %s1524_s18 = smov 0   ;;  %s1526_s19 = smov 0  }
   0xc   :  { %s1528_s20 = smov 0   ;;  %s1530_s21 = smov 0  }
   0xd   :  { %s1532_s22 = smov 0   ;;  %s1534_s23 = smov 0  }
   0xe LB: > { %1930 = sst [smem:[#allocation18_spill]] %s1470_s20  ;;  %s1555_s24 = sadd.s32 4294967295, %s1482_s23   ;;  %s1482_s23 = sphi %s1534_s23, %s31_s23   ;;  %s1478_s22 = sphi %s1532_s22, %s1961_s22   ;;  %s1474_s21 = sphi %s1530_s21, %s1960_s21   ;;  %s1470_s20 = sphi %s1528_s20, %s1956_s20   ;;  %s1466_s19 = sphi %s1526_s19, %s1959_s19   ;;  %s1462_s18 = sphi %s1524_s18, %s1958_s18  }
   0xf   : > { %1931 = sst [smem:[#allocation19_spill]] %s1482_s23  ;;  %s1062_s25 = sadd.s32 4294967294, %s1482_s23  }
  0x10   : > { %s50_s26 = sadd.s32 1, %s1478_s22  ;;  %s61_s27 = sadd.s32 1, %s1470_s20 }
  0x11   : > { %p52_p0 = scmp.ge.s32.totalorder %s50_s26, 2  ;;  %p68_p1 = scmp.ne.s32.totalorder %s1470_s20, %s1466_s19 }
  0x12   : > { %p69_p2 = scmp.eq.s32.totalorder %s1482_s23, 0  ;;  %p74_p3 = scmp.ne.s32.totalorder %s1466_s19, %s1462_s18 }
  0x13   : > { %s1963_s26 = smov (%p52_p0, %s50_s26), 0  ;;  %p75_p5 = scmp.eq.s32.totalorder %s1555_s24, 0 }
  0x14   : > { %1932 = sst [smem:[#allocation20_spill]] %s1963_s26  ;;  %p1567_p4 = por %p69_p2, %p68_p1 }
  0x15   : > { %s54_s29 = ssub.s32 %s1478_s22, %s1963_s26  ;;  %p186_p6 = scmp.eq.s32.totalorder %s1555_s24, 1 }
  0x16   : > { %p59_p7 = scmp.eq.s32.totalorder %s54_s29, 0  ;;  %p1575_p8 = por %p75_p5, %p74_p3 }
  0x17   : > { %p1579_p9 = por %p186_p6, %p68_p1  ;;  %p192_p10 = scmp.eq.s32.totalorder %s1062_s25, 1 }
  0x18   : > { %s1934_s30 = scalar_select %p1575_p8, 1, 0 }
  0x19   : > { %s1935_s6 = scalar_select %p1579_p9, 1, 0 }
  0x1a   : > { %s1584_s7 = scalar_select %p59_p7, %s1470_s20, %s61_s27  }
  0x1b   : > { %p1586_p11 = por %p192_p10, %p74_p3  ;;  %p1170_p13 = scmp.lt.s32.totalorder %s1482_s23, 2 }
  0x1c   : > { %1936 = sst [smem:[#allocation21_spill]] %s1584_s7  ;;  %s1593_s9 = sand.u32 1, %s1470_s20  }
  0x1d   : > { %s1937_s8 = scalar_select %p1586_p11, 1, 0 }
  0x1e   : > { %p1597_p0 = pnand %p1170_p13, %p1567_p4  ;;  %s266_s11 = sand.u32 1, %s1482_s23  }
  0x1f   : > { %1938 = sst [smem:[#allocation22_spill]] %s1937_s8  ;;  %s1915_s12 = sshll.u32 %s1593_s9, 4 }
  0x20   : > { %s1939_s10 = scalar_select %p1597_p0, 1, 0 }
  0x21   : > { %s1916_s13 = sshll.u32 %s1478_s22, 8  ;;  %s270_s14 = scalar_lea.vmem [#allocation5], %s1915_s12 }
  0x22   : > { %s279_s15 = sshll.u32 %s270_s14, 4  ;;  %s1940_s1 = sld [smem:[#allocation23_spill]]  ;;  %s1613_s15 = int_to_ptr.vmem [resolvable:$true] %s279_s15 }
  0x23   : > { %s1615_s27 = scalar_lea.sflag [#allocation6], %s266_s11  ;;  %p1621_p2 = pneg %p1597_p0 }
  0x28   : > { %s1611_s25 = scalar_lea.hbm %s1940_s1, %s1916_s13  ;;  %s1245_s17 = scalar_lea.hbm %s1940_s1, 512 }
  0x29   : > { %s1240_s28 = scalar_lea.hbm %s1611_s25, 256  ;;  %p1246_p5 = scmp.lt.u32.totalorder %s1611_s25, %s1940_s1 }
  0x2a   : > { %p1241_p1 = scmp.ne.s32.totalorder %s1611_s25, %s1240_s28  ;;  %p1247_p6 = scmp.lt.u32.totalorder %s1245_s17, %s1240_s28 }
  0x2b   : > { %p1249_p10 = scmp.lt.u32.totalorder %s1240_s28, %s1611_s25 }
  0x2c   : > { %p1243_p3 = pnand %p1621_p2, %p1241_p1  ;;  %p1248_p7 = por %p1247_p6, %p1246_p5 }
  0x2e   : > { %p1244_p4 = pneg %p1243_p3  ;;  %p1250_p13 = por %p1249_p10, %p1248_p7 }
  0x30   : > { %p1251_p12 = pnand %p1250_p13, %p1244_p4 }
  0x32   : > { %1254 = shalt.err (!%p1251_p12)
}
  0x33   : > { %s1255_s11 = scalar_lea.vmem %s1613_s15, 256  ;;  %s1484_s14 = smov [#allocation5]  }
  0x34   : > { %p1256_p1 = scmp.ne.s32.totalorder %s1613_s15, %s1255_s11  ;;  %s1260_s16 = sshll.u32 %s1484_s14, 4  ;;  %s1261_s16 = int_to_ptr.vmem [resolvable:$false] %s1260_s16 }
  0x35   : > { %s1262_s12 = scalar_lea.vmem %s1261_s16, 512  ;;  %p1263_p9 = scmp.lt.s32.totalorder %s1613_s15, %s1261_s16 }
  0x36   : > { %p1258_p3 = pnand %p1256_p1, %p1621_p2  ;;  %p1264_p8 = scmp.lt.s32.totalorder %s1262_s12, %s1255_s11 }
  0x38   : > { %p1259_p11 = pneg %p1258_p3  ;;  %p1265_p5 = por %p1264_p8, %p1263_p9 }
  0x3a   : > { %p1266_p6 = pnand %p1265_p5, %p1259_p11 }
  0x3c   : > { %1269 = shalt.err (!%p1266_p6)
}
  0x3d   : > { %s1921_s13 = smov 128   ;;  %s1923_s28 = smov 8  }
  0x3e   : > { %1156 = dma.hbm_to_vmem [thread:$0]  (!%p1597_p0), %s1611_s25, 256, %s1613_s15, %s1615_s27, %s1921_s13, %s1921_s13, %s1923_s28  }
  0x3f   : > { %s1942_s17 = sshll.u32 %s1478_s22, 8  ;;  %s1943_s12 = sshll.u32 %s1593_s9, 4 }
  0x40   : > { %s1653_s16 = scalar_lea.hbm %s1911_s2, %s1942_s17  ;;  %s293_s1 = scalar_lea.vmem [#allocation7], %s1943_s12 }
  0x41   : > { %s302_s26 = sshll.u32 %s293_s1, 4  ;;  %p1076_p8 = scmp.ge.s32.totalorder %s1482_s23, 1  ;;  %s1658_s26 = int_to_ptr.vmem [resolvable:$true] %s302_s26 }
  0x42   : > { %p329_p9 = scmp.lt.s32.totalorder %s1482_s23, 3  ;;  %s1065_s20 = sshll.u32 %s1593_s9, 5 }
  0x43   : > { %s1101_s15 = sshll.u32 %s1478_s22, 9  ;;  %s246_s1 = scalar_lea.vmem [#allocation2], %s1065_s20 }
  0x44   : > { %p1661_p11 = pnand %p1076_p8, %p329_p9  ;;  %s1670_s11 = scalar_lea.hbm %s1909_s0, %s1101_s15 }
  0x45   : > { %s256_s17 = sshll.u32 %s246_s1, 4  ;;  %s1074_s14 = sshll.u32 %s1593_s9, 3  ;;  %s1672_s17 = int_to_ptr.vmem [resolvable:$true] %s256_s17 }
  0x46   : > { %s1944_s7 = scalar_select %p1661_p11, 1, 0 }
  0x47   : > { %s243_s12 = scalar_lea.sflag [#allocation3], %s1593_s9  ;;  %s1270_s28 = scalar_lea.hbm %s1670_s11, 512 }
  0x48   : > { %p1271_p12 = scmp.ne.s32.totalorder %s1670_s11, %s1270_s28  ;;  %s1275_s13 = scalar_lea.hbm %s1909_s0, 1024 }
  0x49   : > { %p1276_p10 = scmp.lt.u32.totalorder %s1670_s11, %s1909_s0  ;;  %p1277_p13 = scmp.lt.u32.totalorder %s1275_s13, %s1270_s28 }
  0x4a   : > { %p1273_p4 = pnand %p1271_p12, %p1621_p2  ;;  %p1279_p3 = scmp.lt.u32.totalorder %s1270_s28, %s1670_s11 }
  0x4b   : > { %p1278_p1 = por %p1277_p13, %p1276_p10 }
  0x4c   : > { %p1274_p7 = pneg %p1273_p4 }
  0x4d   : > { %p1280_p5 = por %p1279_p3, %p1278_p1 }
  0x4f   : > { %p1281_p6 = pnand %p1280_p5, %p1274_p7 }
  0x51   : > { %1284 = shalt.err (!%p1281_p6)
}
  0x52   : > { %s1285_s20 = scalar_lea.vmem %s1672_s17, 512  ;;  %s1487_s23 = smov [#allocation2]  }
  0x53   : > { %p1286_p8 = scmp.ne.s32.totalorder %s1672_s17, %s1285_s20  ;;  %s1290_s8 = sshll.u32 %s1487_s23, 4  ;;  %s1291_s8 = int_to_ptr.vmem [resolvable:$false] %s1290_s8 }
  0x54   : > { %s1292_s1 = scalar_lea.vmem %s1291_s8, 1024  ;;  %p1293_p4 = scmp.lt.s32.totalorder %s1672_s17, %s1291_s8 }
  0x55   : > { %p1288_p9 = pnand %p1286_p8, %p1621_p2  ;;  %p1294_p11 = scmp.lt.s32.totalorder %s1292_s1, %s1285_s20 }
  0x57   : > { %p1289_p12 = pneg %p1288_p9  ;;  %p1295_p10 = por %p1294_p11, %p1293_p4 }
  0x59   : > { %p1296_p13 = pnand %p1295_p10, %p1289_p12 }
  0x5b   : > { %1299 = shalt.err (!%p1296_p13)
}
  0x5c   : > { %s1945_s28 = smov 8   ;;  %s1946_s13 = smov 128  }
  0x5d   : > { %1153 = dma.hbm_to_vmem [thread:$0]  (!%p1597_p0), %s1670_s11, 512, %s1672_s17, %s243_s12, %s1946_s13, %s1946_s13, %s1945_s28  }
  0x5e   : > { %s1300_s15 = scalar_lea.hbm %s1653_s16, 256  ;;  %s1305_s23 = scalar_lea.hbm %s1911_s2, 512 }
  0x5f   : > { %p1301_p7 = scmp.ne.s32.totalorder %s1653_s16, %s1300_s15  ;;  %p1306_p3 = scmp.lt.u32.totalorder %s1653_s16, %s1911_s2 }
  0x60   : > { %p1307_p5 = scmp.lt.u32.totalorder %s1305_s23, %s1300_s15  ;;  %p1309_p8 = scmp.lt.u32.totalorder %s1300_s15, %s1653_s16 }
  0x61   : > { %p1303_p11 = pnand %p1301_p7, %p1621_p2 }
  0x62   : > { %p1308_p6 = por %p1307_p5, %p1306_p3 }
  0x63   : > { %p1304_p1 = pneg %p1303_p11 }
  0x64   : > { %p1310_p9 = por %p1309_p8, %p1308_p6 }
  0x66   : > { %p1311_p12 = pnand %p1310_p9, %p1304_p1 }
  0x68   : > { %1314 = shalt.err (!%p1311_p12)
}
  0x69   : > { %s1315_s11 = scalar_lea.vmem %s1658_s26, 256  ;;  %s1488_s17 = smov [#allocation7]  }
  0x6a   : > { %p1316_p4 = scmp.ne.s32.totalorder %s1658_s26, %s1315_s11  ;;  %s1320_s12 = sshll.u32 %s1488_s17, 4  ;;  %s1321_s12 = int_to_ptr.vmem [resolvable:$false] %s1320_s12 }
  0x6b   : > { %s1322_s25 = scalar_lea.vmem %s1321_s12, 512  ;;  %p1323_p7 = scmp.lt.s32.totalorder %s1658_s26, %s1321_s12 }
  0x6c   : > { %p1318_p10 = pnand %p1316_p4, %p1621_p2  ;;  %p1324_p11 = scmp.lt.s32.totalorder %s1322_s25, %s1315_s11 }
  0x6e   : > { %p1319_p13 = pneg %p1318_p10  ;;  %p1325_p3 = por %p1324_p11, %p1323_p7 }
  0x70   : > { %p1326_p5 = pnand %p1325_p3, %p1319_p13 }
  0x72   : > { %1329 = shalt.err (!%p1326_p5)
}
  0x73   : > { %1159 = dma.hbm_to_vmem [thread:$0]  (!%p1597_p0), %s1653_s16, 256, %s1658_s26, %s1615_s27, %s1946_s13, %s1946_s13, %s1945_s28  }
  0x74   : > { %s1075_s15 = sshll.u32 %s1478_s22, 7  ;;  %s316_s1 = scalar_lea.vmem [#allocation8], %s1074_s14 }
  0x75   : > { %s1731_s8 = scalar_lea.hbm %s1912_s3, %s1075_s15  ;;  %s324_s11 = sshll.u32 %s316_s1, 4  ;;  %s325_s11 = int_to_ptr.vmem [resolvable:$true] %s324_s11 }
  0x76   : > { %s313_s17 = scalar_lea.sflag [#allocation9], %s1593_s9  ;;  %s1330_s12 = scalar_lea.hbm %s1731_s8, 128 }
  0x77   : > { %p1331_p1 = scmp.ne.s32.totalorder %s1731_s8, %s1330_s12  ;;  %s1335_s16 = scalar_lea.hbm %s1912_s3, 256 }
  0x78   : > { %p1336_p9 = scmp.lt.u32.totalorder %s1731_s8, %s1912_s3  ;;  %p1337_p12 = scmp.lt.u32.totalorder %s1335_s16, %s1330_s12 }
  0x79   : > { %p1333_p6 = pnand %p1331_p1, %p1621_p2  ;;  %p1339_p10 = scmp.lt.u32.totalorder %s1330_s12, %s1731_s8 }
  0x7a   : > { %p1338_p4 = por %p1337_p12, %p1336_p9 }
  0x7b   : > { %p1334_p8 = pneg %p1333_p6 }
  0x7c   : > { %p1340_p13 = por %p1339_p10, %p1338_p4 }
  0x7e   : > { %p1341_p7 = pnand %p1340_p13, %p1334_p8 }
  0x80   : > { %1344 = shalt.err (!%p1341_p7)
}
  0x81   : > { %s1345_s9 = scalar_lea.vmem %s325_s11, 128  ;;  %s1489_s14 = smov [#allocation8]  }
  0x82   : > { %p1346_p11 = scmp.ne.s32.totalorder %s325_s11, %s1345_s9  ;;  %s1350_s25 = sshll.u32 %s1489_s14, 4  ;;  %s1351_s25 = int_to_ptr.vmem [resolvable:$false] %s1350_s25 }
  0x83   : > { %s1352_s15 = scalar_lea.vmem %s1351_s25, 256  ;;  %p1353_p1 = scmp.lt.s32.totalorder %s325_s11, %s1351_s25 }
  0x84   : > { %p1348_p3 = pnand %p1346_p11, %p1621_p2  ;;  %p1354_p6 = scmp.lt.s32.totalorder %s1352_s15, %s1345_s9 }
  0x86   : > { %p1349_p5 = pneg %p1348_p3  ;;  %p1355_p0 = por %p1354_p6, %p1353_p1 }
  0x88   : > { %p1356_p9 = pnand %p1355_p0, %p1349_p5 }
  0x8a   : > { %1359 = shalt.err (!%p1356_p9)
}
  0x8b   : > { %p1947_p12 = scmp.ne.s32.totalorder %s1939_s10, 0  ;;  %p1948_p8 = scmp.ne.s32.totalorder %s1944_s7, 0 }
  0x8c   : > { %s1756_s29 = sand.u32 (!%p1948_p8), 1, %s1466_s19   ;;  %p1949_p0 = scmp.ne.s32.totalorder (!%p1948_p8), %s1934_s30, 0 }
  0x8d   : > { %1162 = dma.hbm_to_vmem [thread:$0]  (!%p1947_p12), %s1731_s8, 128, %s325_s11, %s313_s17  }
  0x8e   : > { %333 = sbr.rel (%p1948_p8) target bundleno = 925 (0x39d), region = 36  ;;  %s1759_s20 = sshll.u32 (!%p1948_p8), %s1756_s29, 5 }
  0x8f   : > { %s336_s23 = scalar_lea.sflag (!%p1948_p8), [#allocation3], %s1756_s29  ;;  %s339_s1 = scalar_lea.vmem (!%p1948_p8), [#allocation2], %s1759_s20 }
  0x95   : > { %1441 = dma.done.wait (%p1949_p0), %s336_s23, 512  }
  0x96   : > { %1443 = vsyncadd (%p1949_p0), %s336_s23, 4294966784  ;;  %s344_s7 = sand.u32 1, %s1555_s24   ;;  %s1078_s10 = sshll.u32 %s1756_s29, 4 }
  0x97   : > { %s345_s8 = scalar_lea.sflag [#allocation6], %s344_s7  ;;  %s348_s11 = scalar_lea.vmem [#allocation5], %s1078_s10 }
  0x98   : > { %1445 = dma.done.wait (%p1949_p0), %s345_s8, 512  }
  0x99   : > { %1447 = vsyncadd (%p1949_p0), %s345_s8, 4294966784  ;;  %s1080_s17 = sshll.u32 %s1756_s29, 3  ;;  %s1774_s12 = scalar_lea.vmem [#allocation7], %s1078_s10 }
  0x9a   : > { %s363_s26 = scalar_lea.sflag [#allocation9], %s1756_s29  ;;  %s366_s27 = scalar_lea.vmem [#allocation8], %s1080_s17 }
  0x9b   : > { %1449 = dma.done.wait (%p1949_p0), %s363_s26, 128  }
  0x9c   : > { %1451 = vsyncadd (%p1949_p0), %s363_s26, 4294967168  ;;  %vm428_vm0 = vcmask 261120   ;;  %v426_v0 = vld [vmem:[%s348_s11] sm:$0xff]  ;;  %v427_v2 = vld [vmem:[%s348_s11 + $0x8] sm:$0xff]  ;;  %vm602_vm1 = vcmask 64512   ;;  %s412_s24 = scalar_lea.vmem [#allocation11], %s1759_s20 }
  0x9d   : > { %v418_v1 = vld [vmem:[%s339_s1] sm:$0xff]  ;;  %1118 = vmatprep.subr.msk.mxu0 %vm428_vm0, %v426_v0  ;;  %1123 = vmatprep.subr.msk.mxu1 %vm428_vm0, %v427_v2  ;;  %v419_v4 = vld [vmem:[%s339_s1 + $0x8] sm:$0xff]  ;;  %v420_v5 = vld [vmem:[%s339_s1 + $0x10] sm:$0xff]  ;;  %s1104_s30 = sshll.u32 %s1474_s21, 9  ;;  %s860_s9 = sshll.u32 %s412_s24, 4  ;;  %s1816_s9 = int_to_ptr.vmem [resolvable:$true] %s860_s9 }
  0x9e   : > { %v422_v3 = vmul.f32 0.17677669, %v418_v1  ;;  %v421_v6 = vld [vmem:[%s339_s1 + $0x18] sm:$0xff]  ;;  %1119 = vmatpush3.xpose.msk.msra.mxu0 %vm428_vm0, %v426_v0  ;;  %v423_v7 = vmul.f32 0.17677669, %v419_v4  ;;  %1124 = vmatpush3.xpose.msk.msra.mxu1 %vm428_vm0, %v427_v2  ;;  %v597_v10 = vld [vmem:[%s366_s27] sm:$0xff]  ;;  %s1814_s13 = scalar_lea.hbm %s1914_s5, %s1104_s30 }
  0x9f   : > { %v424_v8 = vmul.f32 0.17677669, %v420_v5  ;;  %v425_v9 = vmul.f32 0.17677669, %v421_v6  ;;  %v651_v43 = vld [vmem:[%s1774_s12] sm:$0xff]  ;;  %v652_v44 = vld [vmem:[%s1774_s12 + $0x8] sm:$0xff] }
  0xa0   : > { %1120 = vmatprep.mubr.msk.f32.mxu0 %vm428_vm0, %v422_v3  ;;  %1128 = vmatprep.subr.mxu0 %v651_v43  ;;  %s825_s14 = scalar_lea.sflag [#allocation12], %s1756_s29  ;;  %s1360_s25 = scalar_lea.vmem %s1816_s9, 512 }
  0xa1   : > { %1125 = vmatprep.mubr.msk.f32.mxu1 %vm428_vm0, %v424_v8  ;;  %1121 = vmatmul.mubr.msk.f32.vlgmr.msra.gmra.mrb[0].mxu0 %vm428_vm0, %v423_v7  ;;  %p1361_p2 = scmp.ne.s32.totalorder %s1816_s9, %s1360_s25  ;;  %p1950_p4 = scmp.ne.s32.totalorder %s1935_s6, 0 }
  0xa2   : > { %1126 = vmatmul.mubr.msk.f32.vlgmr.msra.gmra.mrb[0].mxu1 %vm428_vm0, %v425_v9  ;;  %1129 = vmatpush3.msra.mxu0 %v651_v43  ;;  %s1490_s15 = smov [#allocation11]  }
  0xa3   : > { %1133 = vmatprep.subr.mxu1 %v652_v44  ;;  %p1362_p10 = pnand %p1361_p2, %p1950_p4  ;;  %s1364_s23 = sshll.u32 %s1490_s15, 4  ;;  %s1365_s23 = int_to_ptr.vmem [resolvable:$false] %s1364_s23 }
  0xa4   : > { %1134 = vmatpush3.msra.mxu1 %v652_v44  ;;  %s1366_s1 = scalar_lea.vmem %s1365_s23, 1024  ;;  %p1367_p7 = scmp.lt.s32.totalorder %s1816_s9, %s1365_s23 }
  0xa5   : > { %p1363_p13 = pneg %p1362_p10  ;;  %p1368_p11 = scmp.lt.s32.totalorder %s1366_s1, %s1360_s25 }
  0xa7   : > { %p1369_p3 = por %p1368_p11, %p1367_p7 }
  0xa9   : > { %p1370_p5 = pnand %p1369_p3, %p1363_p13 }
 0x174   : > { %v1122_v11 = vpop.f32.mrb[0].mxu0 }
 0x175   : > { %v1127_v12 = vpop.f32.mrb[0].mxu1  ;;  %v599_v13 = vadd.f32 %v1122_v11, %v597_v10  ;;  %v504_v14 = vpop.f32.mrb[1].mxu0 }
 0x176   : > { %v601_v15 = vadd.f32 %v1127_v12, %v597_v10  ;;  %v588_v16 = vpop.f32.mrb[1].mxu1  ;;  %v598_v17 = vadd.f32 %v597_v10, %v504_v14 }
 0x177   : > { %v600_v18 = vadd.f32 %v597_v10, %v588_v16  ;;  %v606_v19 = vsel %vm602_vm1, %v599_v13, -inf }
 0x178   : > { %607 = vmax.xlane.f32.xlu1 %v606_v19  ;;  %v603_v20 = vsel %vm602_vm1, %v598_v17, -inf  ;;  %v612_v21 = vsel %vm602_vm1, %v601_v15, -inf }
 0x179   : > { %604 = vmax.xlane.f32.xlu0 %v603_v20  ;;  %v609_v22 = vsel %vm602_vm1, %v600_v18, -inf }
 0x17c   : > { %613 = vmax.xlane.f32.xlu1 %v612_v21 }
 0x17d   : > { %610 = vmax.xlane.f32.xlu0 %v609_v22 }
 0x205   : > { %v608_v23 = vpop.xlane.xlu1 %607 }
 0x206   : > { %v616_v24 = vsub.f32 %v599_v13, %v608_v23  ;;  %v605_v25 = vpop.xlane.xlu0 %604 }
 0x207   : > { %v615_v26 = vsub.f32 %v598_v17, %v605_v25 }
 0x208   : > { %v621_v27 = vmul.f32 1.442695, %v616_v24 }
 0x209   : > { %v619_v28 = vmul.f32 1.442695, %v615_v26  ;;  %v614_v29 = vpop.xlane.xlu1 %613 }
 0x20a   : > { %v618_v30 = vsub.f32 %v601_v15, %v614_v29  ;;  %v611_v31 = vpop.xlane.xlu0 %610 }
 0x20b   : > { %1224 = vpow2.f32 %v619_v28  ;;  %v617_v32 = vsub.f32 %v600_v18, %v611_v31 }
 0x20c   : > { %1226 = vpow2.f32 %v621_v27  ;;  %v625_v33 = vmul.f32 1.442695, %v618_v30 }
 0x20d   : > { %v623_v34 = vmul.f32 1.442695, %v617_v32 }
 0x20f   : > { %1228 = vpow2.f32 %v623_v34 }
 0x210   : > { %1230 = vpow2.f32 %v625_v33 }
 0x215   : > { %v1225_v35 = vpop.eup %1224 }
 0x216   : > { %v627_v36 = vsel %vm602_vm1, %v1225_v35, 0.0  ;;  %v1227_v37 = vpop.eup %1226 }
 0x217   : > { %628 = vadd.xlane.f32.xlu0 %v627_v36  ;;  %v630_v39 = vsel %vm602_vm1, %v1227_v37, 0.0 }
 0x219   : > { %v1229_v38 = vpop.eup %1228 }
 0x21a   : > { %v633_v40 = vsel %vm602_vm1, %v1229_v38, 0.0  ;;  %v1231_v41 = vpop.eup %1230 }
 0x21b   : > { %631 = vadd.xlane.f32.xlu0 %v630_v39  ;;  %634 = vadd.xlane.f32.xlu1 %v633_v40  ;;  %v636_v42 = vsel %vm602_vm1, %v1231_v41, 0.0 }
 0x21f   : > { %637 = vadd.xlane.f32.xlu1 %v636_v42 }
 0x2a4   : > { %v629_v45 = vpop.xlane.xlu0 %628 }
 0x2a5   : > { %1232 = vrcp.f32 %v629_v45 }
 0x2a8   : > { %v635_v46 = vpop.xlane.xlu1 %634  ;;  %v632_v47 = vpop.xlane.xlu0 %631 }
 0x2a9   : > { %1234 = vrcp.f32 %v635_v46 }
 0x2aa   : > { %1236 = vrcp.f32 %v632_v47 }
 0x2ac   : > { %v638_v48 = vpop.xlane.xlu1 %637 }
 0x2ad   : > { %1238 = vrcp.f32 %v638_v48 }
 0x2af   : > { %v1233_v49 = vpop.eup %1232 }
 0x2b0   : > { %v643_v50 = vmul.f32 %v1233_v49, %v1225_v35 }
 0x2b2   : > { %647 = vst.msk [vmem:[%s412_s24] sm:$0xff] %vm602_vm1, %v643_v50  ;;  %1130 = vmatprep.mubr.msk.f32.mxu0 %vm602_vm1, %v643_v50 }
 0x2b3   : > { %v1235_v51 = vpop.eup %1234 }
 0x2b4   : > { %v1237_v52 = vpop.eup %1236  ;;  %v645_v53 = vmul.f32 %v1235_v51, %v1229_v38 }
 0x2b5   : > { %v644_v54 = vmul.f32 %v1237_v52, %v1227_v37 }
 0x2b6   : > { %649 = vst.msk [vmem:[%s412_s24 + $0x10] sm:$0xff] %vm602_vm1, %v645_v53  ;;  %1135 = vmatprep.mubr.msk.f32.mxu1 %vm602_vm1, %v645_v53 }
 0x2b7   : > { %v1239_v55 = vpop.eup %1238  ;;  %648 = vst.msk [vmem:[%s412_s24 + $0x8] sm:$0xff] %vm602_vm1, %v644_v54  ;;  %1131 = vmatmul.mubr.msk.f32.vlgmr.msra.gmra.mrb[2].mxu0 %vm602_vm1, %v644_v54 }
 0x2b8   : > { %v646_v56 = vmul.f32 %v1239_v55, %v1231_v41 }
 0x2ba   : > { %650 = vst.msk [vmem:[%s412_s24 + $0x18] sm:$0xff] %vm602_vm1, %v646_v56  ;;  %1136 = vmatmul.mubr.msk.f32.vlgmr.msra.gmra.mrb[2].mxu1 %vm602_vm1, %v646_v56 }
 0x2bb   : > { %1373 = shalt.err (!%p1370_p5)
}
 0x2bc   : > { %s1374_s7 = scalar_lea.hbm %s1814_s13, 512  ;;  %s1378_s11 = scalar_lea.hbm %s1914_s5, 1024 }
 0x2bd   : > { %p1375_p1 = scmp.ne.s32.totalorder %s1814_s13, %s1374_s7  ;;  %p1379_p12 = scmp.lt.u32.totalorder %s1814_s13, %s1914_s5 }
 0x2be   : > { %p1380_p8 = scmp.lt.u32.totalorder %s1378_s11, %s1374_s7  ;;  %p1382_p2 = scmp.lt.u32.totalorder %s1374_s7, %s1814_s13 }
 0x2bf   : > { %p1376_p6 = pnand %p1375_p1, %p1950_p4 }
 0x2c0   : > { %p1381_p0 = por %p1380_p8, %p1379_p12 }
 0x2c1   : > { %p1377_p9 = pneg %p1376_p6 }
 0x2c2   : > { %p1383_p10 = por %p1382_p2, %p1381_p0 }
 0x2c4   : > { %p1384_p13 = pnand %p1383_p10, %p1377_p9 }
 0x2c6   : > { %1387 = shalt.err (!%p1384_p13)
}
 0x2c7   : > { %s1491_s26 = smov 128   ;;  %s1492_s27 = smov 8  }
 0x2c8   : > { %1147 = dma.vmem_to_hbm [thread:$0]  (%p1950_p4), %s1816_s9, 512, %s1814_s13, %s825_s14, %s1491_s26, %s1491_s26, %s1492_s27  }
 0x2c9   : > { %s405_s24 = scalar_lea.vmem [#allocation10], %s1759_s20  ;;  %s1855_s13 = scalar_lea.hbm %s1913_s4, %s1104_s30 }
 0x2ca   : > { %s841_s16 = sshll.u32 %s405_s24, 4  ;;  %s820_s20 = scalar_lea.sflag [#allocation4], %s1756_s29  ;;  %s1847_s16 = int_to_ptr.vmem [resolvable:$true] %s841_s16 }
 0x2cb   : > { %s1388_s9 = scalar_lea.vmem %s1847_s16, 512  ;;  %s1493_s14 = smov [#allocation10]  }
 0x2cc   : > { %p1389_p7 = scmp.ne.s32.totalorder %s1847_s16, %s1388_s9  ;;  %s1392_s15 = sshll.u32 %s1493_s14, 4  ;;  %s1393_s15 = int_to_ptr.vmem [resolvable:$false] %s1392_s15 }
 0x2cd   : > { %s1394_s21 = scalar_lea.vmem %s1393_s15, 1024  ;;  %p1395_p5 = scmp.lt.s32.totalorder %s1847_s16, %s1393_s15 }
 0x2ce   : > { %p1390_p11 = pnand %p1389_p7, %p1950_p4  ;;  %p1396_p1 = scmp.lt.s32.totalorder %s1394_s21, %s1388_s9 }
 0x2d0   : > { %p1391_p3 = pneg %p1390_p11  ;;  %p1397_p6 = por %p1396_p1, %p1395_p5 }
 0x2d2   : > { %p1398_p9 = pnand %p1397_p6, %p1391_p3 }
 0x38a   : > { %v1132_v57 = vpop.f32.mrb[2].mxu0 }
 0x38b   : > { %816 = vst.msk [vmem:[%s405_s24 + $0x8] sm:$0xff] %vm428_vm0, %v1132_v57  ;;  %v725_v58 = vpop.f32.mrb[3].mxu0 }
 0x38c   : > { %815 = vst.msk [vmem:[%s405_s24] sm:$0xff] %vm428_vm0, %v725_v58 }
 0x38d   : > { %v1137_v59 = vpop.f32.mrb[2].mxu1 }
 0x38e   : > { %818 = vst.msk [vmem:[%s405_s24 + $0x18] sm:$0xff] %vm428_vm0, %v1137_v59  ;;  %v806_v60 = vpop.f32.mrb[3].mxu1 }
 0x38f   : > { %817 = vst.msk [vmem:[%s405_s24 + $0x10] sm:$0xff] %vm428_vm0, %v806_v60 }
 0x390   : > { %1401 = shalt.err (!%p1398_p9)
}
 0x391   : > { %s1402_s30 = scalar_lea.hbm %s1855_s13, 512  ;;  %s1406_s7 = scalar_lea.hbm %s1913_s4, 1024 }
 0x392   : > { %p1403_p12 = scmp.ne.s32.totalorder %s1855_s13, %s1402_s30  ;;  %p1407_p2 = scmp.lt.u32.totalorder %s1855_s13, %s1913_s4 }
 0x393   : > { %p1408_p10 = scmp.lt.u32.totalorder %s1406_s7, %s1402_s30  ;;  %p1410_p7 = scmp.lt.u32.totalorder %s1402_s30, %s1855_s13 }
 0x394   : > { %p1404_p8 = pnand %p1403_p12, %p1950_p4 }
 0x395   : > { %p1409_p13 = por %p1408_p10, %p1407_p2 }
 0x396   : > { %p1405_p0 = pneg %p1404_p8 }
 0x397   : > { %p1411_p11 = por %p1410_p7, %p1409_p13 }
 0x399   : > { %p1412_p3 = pnand %p1411_p11, %p1405_p0 }
 0x39b   : > { %1415 = shalt.err (!%p1412_p3)
}
 0x39c   : > { %1146 = dma.vmem_to_hbm [thread:$0]  (%p1950_p4), %s1847_s16, 512, %s1855_s13, %s820_s20, %s1491_s26, %s1491_s26, %s1492_s27  }
 0x39d PF: > { %s1951_s11 = sld [smem:[#allocation22_spill]]  ;;  %s1952_s17 = sld [smem:[#allocation19_spill]] }
 0x39e   : > { %s875_s12 = sand.u32 1, %s1462_s18  }
 0x39f   : > { %s876_s24 = scalar_lea.sflag [#allocation4], %s875_s12 }
 0x3a3   : > { %p1953_p5 = scmp.ne.s32.totalorder %s1951_s11, 0  ;;  %p1954_p1 = scmp.ge.s32.totalorder %s1952_s17, 2 }
 0x3a5   : > { %p1164_p6 = pnand %p1954_p1, %p1953_p5 }
 0x3a7   : > { %1453 = dma.done.wait (!%p1164_p6), %s876_s24, 512  }
 0x3a8   : > { %1455 = vsyncadd (!%p1164_p6), %s876_s24, 4294966784  ;;  %s885_s6 = scalar_lea.sflag [#allocation12], %s875_s12 }
 0x3a9   : > { %1457 = dma.done.wait (!%p1164_p6), %s885_s6, 512  }
 0x3aa   : > { %1459 = vsyncadd (!%p1164_p6), %s885_s6, 4294966784  ;;  %s31_s23 = sadd.s32 1, %s1952_s17   ;;  %s1955_s29 = sld [smem:[#allocation18_spill]] }
 0x3ab   : > { %p28_p9 = scmp.ge.s32.totalorder %s31_s23, 4   ;;  %s1956_s20 = sld [smem:[#allocation21_spill]] }
 0x3ac   : > { %s1957_s26 = sld [smem:[#allocation20_spill]]  ;;  %s1958_s18 = smov %s1466_s19 }
 0x3ad   : > { %s1960_s21 = smov %s1478_s22  ;;  %30 = sbr.rel (!%p28_p9) target bundleno = 14 (0xe), region = 135 }
 0x3b0   : > { %s1959_s19 = smov %s1955_s29 }
 0x3b2   : > { %s1961_s22 = smov %s1957_s26 }
 0x3b4   :  { %890 = vsyncpa [#allocation3], 1 }
 0x3b5   :  { %892 = vsyncpa [#allocation3 + $0x1], 1 }
 0x3b6   :  { %893 = vsyncpa [#allocation6], 1 }
 0x3b7   :  { %895 = vsyncpa [#allocation6 + $0x1], 1 }
 0x3b8   :  { %896 = vsyncpa [#allocation9], 1 }
 0x3b9   :  { %898 = vsyncpa [#allocation9 + $0x1], 1 }
 0x3ba   :  { %899 = vsyncpa [#allocation4], 1 }
 0x3bb   :  { %901 = vsyncpa [#allocation4 + $0x1], 1 }
 0x3bc   :  { %902 = vsyncpa [#allocation12], 1 }
 0x3bd   :  { %904 = vsyncpa [#allocation12 + $0x1], 1 }

</bundles_post_ra>
